<compile_context>
chip_gen: v7x
topology: tpu7x:2x2x1
jax: 0.10.0
libtpu: 0.0.40
codegen_flags: <defaults>
</compile_context>

<pallas_src>
import jax
import jax.numpy as jnp
from jax.experimental import pallas as pl
from jax.experimental.pallas import tpu as pltpu


def _film_kernel(sp1_ref, sh_ref, x_ref, o_ref):
    # sp1_ref, sh_ref: [1, C, 1]   per-batch modulation (lane-broadcast over T)
    # x_ref, o_ref:    [1, C, tT]
    o_ref[...] = x_ref[...] * sp1_ref[...] + sh_ref[...]


def _auto_t_tile(C, T, itemsize, target_block_bytes):
    """Byte-targeted lane tile: ~target_block_bytes per x block, multiple of 128."""
    bytes_per_lane = max(C * itemsize, 1)
    tT = (target_block_bytes // bytes_per_lane) // 128 * 128
    tT = max(tT, 128)
    if tT >= T:
        return T          # single full-T block (legal: equals full array dim)
    return tT


def film(x, c, weight, bias, *, t_tile=None, target_block_bytes=3 << 20):
    """FiLM forward: y = x * (1 + scale) + shift, modulation from Linear(c).

    x:      [B, C, T]   (PyTorch NCL layout; T maps to the TPU lane axis)
    c:      [B, D]
    weight: [2*C, D]    (PyTorch nn.Linear layout)
    bias:   [2*C]
    t_tile: optional explicit lane tile (must be a multiple of 128 if < T);
            default is byte-targeted auto-selection.
    """
    B, C, T = x.shape
    itemsize = jnp.dtype(x.dtype).itemsize

    # ---- Hoisted tiny projection (plain JAX, f32 accumulation) --------------
    ss = jnp.dot(c.astype(jnp.float32), weight.T.astype(jnp.float32),
                 preferred_element_type=jnp.float32) + bias.astype(jnp.float32)
    scale_p1 = (1.0 + ss[:, :C]).astype(x.dtype).reshape(B, C, 1)   # [B, C, 1]
    shift = ss[:, C:].astype(x.dtype).reshape(B, C, 1)              # [B, C, 1]

    # ---- Lane-axis tile selection (no pad; ragged last block is fine) -------
    if t_tile is None:
        tT = _auto_t_tile(C, T, itemsize, target_block_bytes)
        # v7x megacore: guarantee >= 2 grid steps when B == 1 so both TCs work.
        if B == 1 and tT >= T and T > 128:
            tT = min(T, pl.cdiv(pl.cdiv(T, 2), 128) * 128)
    else:
        tT = min(t_tile, T)
        if tT < T and tT % 128 != 0:
            raise ValueError("t_tile must be a multiple of 128 when t_tile < T")

    n_t = pl.cdiv(T, tT)
    grid = (B, n_t)

    x_bytes = B * C * T * itemsize
    mod_bytes = 2 * B * C * itemsize
    cost = pl.CostEstimate(flops=2 * B * C * T, transcendentals=0,
                           bytes_accessed=2 * x_bytes + 2 * mod_bytes)

    out = pl.pallas_call(
        _film_kernel,
        out_shape=jax.ShapeDtypeStruct((B, C, T), x.dtype),
        grid_spec=pltpu.PrefetchScalarGridSpec(
            num_scalar_prefetch=0,
            grid=grid,
            in_specs=[
                pl.BlockSpec((1, C, 1), lambda b, t: (b, 0, 0)),     # 1 + scale
                pl.BlockSpec((1, C, 1), lambda b, t: (b, 0, 0)),     # shift
                pl.BlockSpec((1, C, tT), lambda b, t: (b, 0, t)),    # x
            ],
            out_specs=pl.BlockSpec((1, C, tT), lambda b, t: (b, 0, t)),
        ),
        compiler_params=pltpu.CompilerParams(
            dimension_semantics=("parallel", "parallel")),
        cost_estimate=cost,
    )(scale_p1, shift, x)

    return out


def film_reference(x, c, weight, bias):
    ss = c @ weight.T + bias            # [B, 2C]
    C = x.shape[1]
    scale = ss[:, :C][:, :, None]
    shift = ss[:, C:][:, :, None]
    return x * (1.0 + scale) + shift


def _make_inputs(key, B, C, T, D):
    kx, kc, kw, kb = jax.random.split(key, 4)
    x = jax.random.normal(kx, (B, C, T), dtype=jnp.float32)
    c = jax.random.normal(kc, (B, D), dtype=jnp.float32)
    bound = 1.0 / jnp.sqrt(jnp.float32(D))
    weight = jax.random.uniform(kw, (2 * C, D), dtype=jnp.float32,
                                minval=-bound, maxval=bound)
    bias = jax.random.uniform(kb, (2 * C,), dtype=jnp.float32,
                              minval=-bound, maxval=bound)
    return x, c, weight, bias


if __name__ == "__main__":
    key = jax.random.PRNGKey(0)
    k1, k2 = jax.random.split(key)

    # Small demo shapes (auto tiling -> single full-T block per batch row).
    B, C, T, D = 2, 4, 16, 8
    x, c, weight, bias = _make_inputs(k1, B, C, T, D)
    out = jax.block_until_ready(film(x, c, weight, bias))
    ref = film_reference(x, c, weight, bias)
    assert out.shape == (B, C, T)
    assert jnp.allclose(out, ref, atol=1e-5, rtol=1e-5), "mismatch (small shape)"

    # Exercise the unpadded ragged-edge path: T not a multiple of the T tile,
    # so the last block's reads overrun (harmless) and its stores are clipped.
    B2, C2, T2, D2 = 2, 8, 640, 16
    x2, c2, w2, b2 = _make_inputs(k2, B2, C2, T2, D2)
    out2 = jax.block_until_ready(film(x2, c2, w2, b2, t_tile=256))
    ref2 = film_reference(x2, c2, w2, b2)
    assert out2.shape == (B2, C2, T2)
    assert jnp.allclose(out2, ref2, atol=1e-5, rtol=1e-5), "mismatch (ragged-edge tiled shape)"
    # Explicitly check the clipped edge region matches the reference.
    assert jnp.allclose(out2[..., 512:], ref2[..., 512:], atol=1e-5, rtol=1e-5), "mismatch (edge tile)"

    print("KERNEL_OK")
</pallas_src>

<mosaic_0001>
module attributes {stable_mosaic.version = 11 : i64} {
  func.func @_film_kernel(%arg0: i32, %arg1: i32, %arg2: memref<1x4x1xf32, #tpu.memory_space<vmem>>, %arg3: memref<1x4x1xf32, #tpu.memory_space<vmem>>, %arg4: memref<1x4x16xf32, #tpu.memory_space<vmem>>, %arg5: memref<1x4x16xf32, #tpu.memory_space<vmem>>) attributes {dimension_semantics = [#tpu.dimension_semantics<parallel>, #tpu.dimension_semantics<parallel>], iteration_bounds = array<i64: 2, 1>, scalar_prefetch = 0 : i64, scratch_operands = 0 : i64, tpu.core_type = #tpu.core_type<tc>, window_params = [{transform_indices = @transform_0, window_bounds = array<i64: 1, 4, 1>}, {transform_indices = @transform_1, window_bounds = array<i64: 1, 4, 1>}, {transform_indices = @transform_2, window_bounds = array<i64: 1, 4, 16>}, {transform_indices = @transform_3, window_bounds = array<i64: 1, 4, 16>}]} {
    %c0 = arith.constant 0 : index
    %c0_0 = arith.constant 0 : index
    %c0_1 = arith.constant 0 : index
    %0 = vector.load %arg4[%c0, %c0_0, %c0_1] : memref<1x4x16xf32, #tpu.memory_space<vmem>>, vector<1x4x16xf32>
    %c0_2 = arith.constant 0 : index
    %c0_3 = arith.constant 0 : index
    %c0_4 = arith.constant 0 : index
    %1 = vector.load %arg2[%c0_2, %c0_3, %c0_4] : memref<1x4x1xf32, #tpu.memory_space<vmem>>, vector<1x4x1xf32>
    %2 = vector.broadcast %1 : vector<1x4x1xf32> to vector<1x4x16xf32>
    %3 = arith.mulf %0, %2 : vector<1x4x16xf32>
    %c0_5 = arith.constant 0 : index
    %c0_6 = arith.constant 0 : index
    %c0_7 = arith.constant 0 : index
    %4 = vector.load %arg3[%c0_5, %c0_6, %c0_7] : memref<1x4x1xf32, #tpu.memory_space<vmem>>, vector<1x4x1xf32>
    %5 = vector.broadcast %4 : vector<1x4x1xf32> to vector<1x4x16xf32>
    %6 = arith.addf %3, %5 : vector<1x4x16xf32>
    %c0_8 = arith.constant 0 : index
    %c0_9 = arith.constant 0 : index
    %c0_10 = arith.constant 0 : index
    %7 = vector.load %arg5[%c0_8, %c0_9, %c0_10] : memref<1x4x16xf32, #tpu.memory_space<vmem>>, vector<1x4x16xf32>
    tpu.vector_store %arg5[%c0_8, %c0_9, %c0_10], %6 {strides = array<i32>} : memref<1x4x16xf32, #tpu.memory_space<vmem>>, vector<1x4x16xf32>,
    return
  }
  func.func @transform_0(%arg0: i32, %arg1: i32) -> (i32, i32, i32) {
    %c0_i32 = arith.constant 0 : i32
    %c0_i32_0 = arith.constant 0 : i32
    %c0_i32_1 = arith.constant 0 : i32
    return %arg0, %c0_i32, %c0_i32_0 : i32, i32, i32
  }
  func.func @transform_1(%arg0: i32, %arg1: i32) -> (i32, i32, i32) {
    %c0_i32 = arith.constant 0 : i32
    %c0_i32_0 = arith.constant 0 : i32
    %c0_i32_1 = arith.constant 0 : i32
    return %arg0, %c0_i32, %c0_i32_0 : i32, i32, i32
  }
  func.func @transform_2(%arg0: i32, %arg1: i32) -> (i32, i32, i32) {
    %c0_i32 = arith.constant 0 : i32
    %c0_i32_0 = arith.constant 0 : i32
    return %arg0, %c0_i32, %arg1 : i32, i32, i32
  }
  func.func @transform_3(%arg0: i32, %arg1: i32) -> (i32, i32, i32) {
    %c0_i32 = arith.constant 0 : i32
    %c0_i32_0 = arith.constant 0 : i32
    return %arg0, %c0_i32, %arg1 : i32, i32, i32
  }
}

</mosaic_0001>

<bundles_post_ra>
// kernel: tpu_custom_call.1
= control target key start
LH: loop header
LB: loop body
LE: loop exit
PB: predicated region body
PF: predicated region fallthrough
CT: control target
= control target key end

     0   :  { %8 = vsyncpa [#allocation3], 0  ;;  %s642_s0 = inlined_call_operand.vmem [shape: f32[2,4,1], index: 0, kind: input, shape index: {}]   ;;  %s643_s1 = inlined_call_operand.vmem [shape: f32[2,4,1], index: 1, kind: input, shape index: {}]   ;;  %s644_s2 = inlined_call_operand.vmem [shape: f32[2,4,16], index: 2, kind: input, shape index: {}]   ;;  %s645_s3 = inlined_call_operand.hbm [shape: f32[2,4,16], index: 3, kind: output, shape index: {}]  }
   0x1   :  { %10 = vsyncpa [#allocation3 + $0x1], 0  ;;  %s524_s12 = smov 0   ;;  %s526_s13 = smov 0  }
   0x2   :  { %s528_s14 = smov 0   ;;  %s530_s15 = smov 0  }
   0x3   :  { %s532_s16 = smov 0   ;;  %s534_s17 = smov 0  }
   0x4 LB: > { %s352_s18 = sadd.s32 4294967295, %s500_s17   ;;  %s353_s19 = sadd.s32 4294967294, %s500_s17   ;;  %s500_s17 = sphi %s534_s17, %s16_s17   ;;  %s496_s16 = sphi %s532_s16, %s652_s16   ;;  %s492_s15 = sphi %s530_s15, %s651_s15   ;;  %s488_s14 = sphi %s528_s14, %s650_s14   ;;  %s484_s13 = sphi %s526_s13, %s649_s13   ;;  %s480_s12 = sphi %s524_s12, %s648_s12  }
   0x5   : > { %s28_s20 = sadd.s32 1, %s496_s16  ;;  %s117_s21 = sadd.s32 1, %s488_s14 }
   0x6   : > { %p30_p0 = scmp.ge.s32.totalorder %s28_s20, 2  ;;  %p127_p1 = scmp.ne.s32.totalorder %s488_s14, %s484_s13 }
   0x7   : > { %p128_p2 = scmp.eq.s32.totalorder %s352_s18, 1  ;;  %p133_p3 = scmp.ne.s32.totalorder %s484_s13, %s480_s12 }
   0x8   : > { %s654_s20 = smov (%p30_p0, %s28_s20), 0  ;;  %p134_p5 = scmp.eq.s32.totalorder %s353_s19, 1 }
   0x9   : > { %p564_p4 = por %p128_p2, %p127_p1  ;;  %s112_s23 = ssub.s32 %s496_s16, %s654_s20 }
   0xa   : > { %p356_p6 = scmp.ge.s32.totalorder %s500_s17, 1  ;;  %p115_p7 = scmp.eq.s32.totalorder %s112_s23, 0 }
   0xb   : > { %p571_p8 = por %p134_p5, %p133_p3  ;;  %p176_p9 = scmp.lt.s32.totalorder %s500_s17, 3 }
   0xc   : > { %s577_s25 = scalar_select %p115_p7, %s488_s14, %s117_s21  }
   0xd   : > { %p177_p10 = pnand %p356_p6, %p176_p9 }
   0xe   : > { %p210_p11 = scmp.lt.s32.totalorder (!%p177_p10), %s492_s15, 1  ;;  %v502_v0 = vmov (!%p177_p10), 0   ;;  %s207_s7 = sand.u32 (!%p177_p10), 1, %s484_s13   ;;  %vm240_vm0 = vcmask (!%p177_p10), 125952  }
   0xf   : > { %180 = sbr.rel (%p177_p10) target bundleno = 175 (0xaf), region = 32  ;;  %421 = vset.pattern.permute.xlu0 (!%p177_p10), %v502_v0  ;;  %s357_s8 = sshll.u32 (!%p177_p10), %s207_s7, 2 }
  0x10   : > { %s362_s18 = sshll.u32 (!%p177_p10), %s492_s15, 6  ;;  %s209_s19 = scalar_lea.vmem (!%p177_p10), [#allocation2], %s357_s8 }
  0x11   : > { %s257_s21 = sshll.u32 (!%p177_p10), %s209_s19, 4  ;;  %s595_s28 = scalar_lea.hbm (!%p177_p10), %s645_s3, %s362_s18  ;;  %s597_s21 = int_to_ptr.vmem [resolvable:$true] %s257_s21 }
  0x12   : > { %s422_s29 = scalar_lea.vmem (!%p177_p10), %s597_s21, 64 }
  0x13   : > { %p423_p12 = scmp.ne.s32.totalorder (!%p177_p10), %s597_s21, %s422_s29 }
  0x15   : > { %p424_p13 = pnand (!%p177_p10), %p423_p12, %p564_p4 }
  0x16   : > { %s211_s26 = scalar_select %p210_p11, %s492_s15, 1 }
  0x17   : > { %p425_p0 = pneg %p424_p13  ;;  %s503_s15 = smov [#allocation2]  }
  0x18   : > { %s358_s27 = sshll.u32 %s211_s26, 2 }
  0x19   : > { %s213_s30 = scalar_lea.vmem %s642_s0, %s358_s27  ;;  %s217_s6 = scalar_lea.vmem %s643_s1, %s358_s27 }
  0x1a   : > { %v226_v1 = vld [vmem:[%s213_s30] sm:$0xf]  ;;  %s224_s11 = scalar_lea.vmem %s644_s2, %s358_s27  ;;  %s243_s27 = scalar_lea.sflag [#allocation3], %s207_s7 }
  0x1b   : > { %229 = vperm.xlu0 %421, %v226_v1   ;;  %v233_v2 = vld [vmem:[%s217_s6] sm:$0xf]  ;;  %s426_s30 = sshll.u32 %s503_s15, 4  ;;  %s427_s30 = int_to_ptr.vmem [resolvable:$false] %s426_s30 }
  0x1c   : > { %v225_v3 = vld [vmem:[%s224_s11] sm:$0xf]  ;;  %s428_s4 = scalar_lea.vmem %s427_s30, 128  ;;  %p429_p1 = scmp.lt.s32.totalorder %s597_s21, %s427_s30 }
  0x1d   : > { %p430_p2 = scmp.lt.s32.totalorder %s428_s4, %s422_s29 }
  0x1f   : > { %236 = vperm.xlu0 %421, %v233_v2   ;;  %p431_p3 = por %p430_p2, %p429_p1 }
  0x21   : > { %p432_p5 = pnand %p431_p3, %p425_p0 }
  0x9a   : > { %v230_v4 = vpop.permute.xlu0 %229 }
  0x9b   : > { %v232_v5 = vmul.f32 %v230_v4, %v225_v3 }
  0x9e   : > { %v237_v6 = vpop.permute.xlu0 %236 }
  0x9f   : > { %v239_v7 = vadd.f32 %v237_v6, %v232_v5 }
  0xa1   : > { %241 = vst.msk [vmem:[%s209_s19] sm:$0xf] %vm240_vm0, %v239_v7 }
  0xa2   : > { %435 = shalt.err (!%p432_p5)
}
  0xa3   : > { %s436_s5 = scalar_lea.hbm %s595_s28, 64  ;;  %s440_s8 = scalar_lea.hbm %s645_s3, 128 }
  0xa4   : > { %p437_p6 = scmp.ne.s32.totalorder %s595_s28, %s436_s5  ;;  %p441_p10 = scmp.lt.u32.totalorder %s595_s28, %s645_s3 }
  0xa5   : > { %p442_p11 = scmp.lt.u32.totalorder %s440_s8, %s436_s5  ;;  %p444_p13 = scmp.lt.u32.totalorder %s436_s5, %s595_s28 }
  0xa6   : > { %p438_p7 = pnand %p437_p6, %p564_p4 }
  0xa7   : > { %p443_p12 = por %p442_p11, %p441_p10 }
  0xa8   : > { %p439_p9 = pneg %p438_p7 }
  0xa9   : > { %p445_p0 = por %p444_p13, %p443_p12 }
  0xab   : > { %p446_p1 = pnand %p445_p0, %p439_p9 }
  0xad   : > { %449 = shalt.err (!%p446_p1)
}
  0xae   : > { %365 = dma.vmem_to_hbm [thread:$0]  (%p564_p4), %s597_s21, 64, %s595_s28, %s243_s27  }
  0xaf PF: > { %p371_p2 = scmp.ge.s32.totalorder %s500_s17, 2  ;;  %s269_s11 = sand.u32 1, %s480_s12  }
  0xb0   : > { %s270_s18 = scalar_lea.sflag [#allocation3], %s269_s11 }
  0xb1   : > { %p368_p3 = pnand %p371_p2, %p571_p8 }
  0xb3   : > { %475 = dma.done.wait (!%p368_p3), %s270_s18, 64  }
  0xb4   : > { %477 = vsyncadd (!%p368_p3), %s270_s18, 4294967232  ;;  %s16_s17 = sadd.s32 1, %s500_s17   ;;  %s648_s12 = smov %s484_s13 }
  0xb5   : > { %p13_p5 = scmp.ge.s32.totalorder %s16_s17, 4   ;;  %s649_s13 = smov %s488_s14 }
  0xb6   : > { %s650_s14 = smov %s577_s25  ;;  %s651_s15 = smov %s496_s16 }
  0xb7   : > { %s652_s16 = smov %s654_s20  ;;  %15 = sbr.rel (!%p13_p5) target bundleno = 4 (0x4), region = 73 }
  0xbe   :  { %275 = vsyncpa [#allocation3], 1 }
  0xbf   :  { %277 = vsyncpa [#allocation3 + $0x1], 1 }

</bundles_post_ra>
